<compile_context>
chip_gen: v7x
topology: tpu7x:2x2x1
jax: 0.10.0
libtpu: 0.0.40
codegen_flags: <defaults>
</compile_context>

<pallas_src>
import functools

import jax
import jax.numpy as jnp
from jax.experimental import pallas as pl
from jax.experimental.pallas import tpu as pltpu


def _round_up(v, m):
    return ((v + m - 1) // m) * m


_VMEM_CAP = None


def _vmem_capacity_bytes():
    """Per-core VMEM capacity; conservative 64 MiB (v7x per-TC) fallback."""
    global _VMEM_CAP
    if _VMEM_CAP is None:
        try:
            _VMEM_CAP = int(pltpu.get_tpu_info().vmem_capacity_bytes)
        except Exception:
            _VMEM_CAP = 64 * 1024 * 1024
    return _VMEM_CAP


def net_a_kernel(x_ref, w1_ref, b1_ref, w2t_ref, b2_ref, out_ref):
    # x may arrive in bf16; all math is done in f32.
    x = x_ref[...].astype(jnp.float32)                        # (TB, S, D_in)
    w1 = w1_ref[...]                                          # (1, D_in)
    b1 = b1_ref[...]                                          # (1, 1)
    w2t = w2t_ref[...]                                        # (D_in, D_out_pad)
    b2 = b2_ref[...]                                          # (1, D_out_pad)

    # Mask out sequence positions whose feature-sum is exactly zero.
    row_sum = jnp.sum(x, axis=2)                              # (TB, S)
    mask = (row_sum != 0.0).astype(jnp.float32)               # (TB, S)

    # linear1 attention score: VPU multiply + XLU lane reduce (no N=1 matmul).
    scores = jnp.sum(x * w1[None, :, :], axis=2) + b1         # (TB, S)
    # NOTE: the reference's `scores * mask` is redundant: masked rows have
    # x == 0, so their raw score is b1 (finite), and `exps * mask` below
    # zeroes them either way. Dropping it is exact.
    masked_exps = jnp.exp(scores) * mask                      # (TB, S)
    denom = jnp.sum(masked_exps, axis=1, keepdims=True) + 1e-5
    alphas = masked_exps / denom                              # exact (TB,1) divide

    # Attention-weighted pooling over the sequence axis.
    pooled = jnp.sum(x * alphas[:, :, None], axis=1)          # (TB, D_in)

    # linear2 projection on the MXU (lane-dense D_out_pad columns).
    out = jnp.dot(pooled, w2t, preferred_element_type=jnp.float32) + b2
    out_ref[...] = out.astype(out_ref.dtype)


def _choose_batch_tile(B, S, D_in, D_out_pad, x_itemsize):
    """Byte-based batch-tile sizing against tile-padded VMEM footprints."""
    cap = _vmem_capacity_bytes()
    budget = int(cap * 0.55)        # tile budget (headroom for compiler scratch)
    vmem_limit = int(cap * 0.75)    # scoped limit handed to Mosaic

    s_pad = _round_up(S, 8)
    din_pad = _round_up(D_in, 128)

    # Double-buffered, (8,128)-padded per-row footprints.
    x_row_bytes = s_pad * din_pad * x_itemsize
    out_row_bytes = D_out_pad * 4
    weight_bytes = 2 * 4 * (
        8 * din_pad                        # w1  (1, D_in)
        + 8 * 128                          # b1  (1, 1)
        + _round_up(D_in, 8) * D_out_pad   # w2t (D_in, D_out_pad)
        + 8 * D_out_pad                    # b2  (1, D_out_pad)
    )

    avail = max(budget - weight_bytes, 16 * (x_row_bytes + out_row_bytes))
    tb = avail // (2 * (x_row_bytes + out_row_bytes))
    tb = max(8, (tb // 8) * 8)

    b_ceil = _round_up(B, 8)
    tb = min(tb, b_ceil)
    # Keep at least 2 grid steps when the batch allows it so
    # dimension_semantics=("parallel",) can shard across v7x's 2 TensorCores.
    if B >= 16 and tb >= b_ceil:
        tb = max(8, _round_up((B + 1) // 2, 8))
    return tb, vmem_limit


def make_net_a_params(D_in, D_out, seed=0):
    """PyTorch-style uniform(-1/sqrt(fan_in)) init. Weights are stored
    pre-transposed and D_out is zero-padded to a multiple of 128 so the
    kernel's output / MXU path is lane-dense (sliced back after the call)."""
    key = jax.random.PRNGKey(seed)
    k1w, k1b, k2w, k2b = jax.random.split(key, 4)
    bound = 1.0 / (D_in ** 0.5)
    w1 = jax.random.uniform(k1w, (1, D_in), jnp.float32, -bound, bound)
    b1 = jax.random.uniform(k1b, (1, 1), jnp.float32, -bound, bound)
    w2 = jax.random.uniform(k2w, (D_out, D_in), jnp.float32, -bound, bound)
    b2 = jax.random.uniform(k2b, (1, D_out), jnp.float32, -bound, bound)

    d_out_pad = _round_up(D_out, 128)
    w2t = jnp.zeros((D_in, d_out_pad), jnp.float32).at[:, :D_out].set(w2.T)
    b2p = jnp.zeros((1, d_out_pad), jnp.float32).at[:, :D_out].set(b2)
    return dict(w1_row=w1, b1=b1, w2t=w2t, b2=b2p, d_out=D_out)


@functools.partial(jax.jit, static_argnames=("d_out",))
def _net_a_forward(x, w1_row, b1, w2t, b2, *, d_out):
    B, S, D_in = x.shape
    D_out_pad = w2t.shape[1]

    TB, vmem_limit = _choose_batch_tile(B, S, D_in, D_out_pad, x.dtype.itemsize)
    num_tiles = pl.cdiv(B, TB)
    B_pad = num_tiles * TB   # only the (tiny) output buffer is padded; x is not copied

    cost = pl.CostEstimate(
        flops=int(B * (5 * S * D_in + 2 * D_in * D_out_pad)),
        transcendentals=int(B * S),
        bytes_accessed=int(x.dtype.itemsize * B * S * D_in
                           + 4 * (B_pad * D_out_pad + D_in * D_out_pad
                                  + D_in + D_out_pad + 1)),
    )

    # TODO(synk): for production shapes with D_in < 128, repack x to lane-dense
    # (B, S*D_in) slabs (strided in-kernel reductions) instead of shipping a
    # <128-lane pipeline; and for very large D_in*D_out add a second grid axis
    # over D_out tiles with the pooled vector cached in VMEM scratch.
    out = pl.pallas_call(
        net_a_kernel,
        out_shape=jax.ShapeDtypeStruct((B_pad, D_out_pad), jnp.float32),
        grid=(num_tiles,),
        in_specs=[
            pl.BlockSpec((TB, S, D_in), lambda i: (i, 0, 0)),    # x (ragged last tile OK)
            pl.BlockSpec((1, D_in), lambda i: (0, 0)),           # w1, VMEM-resident
            pl.BlockSpec((1, 1), lambda i: (0, 0)),              # b1, VMEM-resident
            pl.BlockSpec((D_in, D_out_pad), lambda i: (0, 0)),   # w2^T, VMEM-resident
            pl.BlockSpec((1, D_out_pad), lambda i: (0, 0)),      # b2, VMEM-resident
        ],
        out_specs=pl.BlockSpec((TB, D_out_pad), lambda i: (i, 0)),
        compiler_params=pltpu.CompilerParams(
            dimension_semantics=("parallel",),
            vmem_limit_bytes=vmem_limit,
        ),
        cost_estimate=cost,
    )(x, w1_row, b1, w2t, b2)

    # Rows >= B of the last (ragged) tile hold per-row garbage; drop them
    # along with the zero-padded D_out columns.
    return out[:B, :d_out]


def net_a_forward(params, x):
    return _net_a_forward(x, params["w1_row"], params["b1"],
                          params["w2t"], params["b2"], d_out=params["d_out"])


def net_a_reference(params, x):
    """Pure-JAX reference mirroring the PyTorch forward exactly."""
    d_out = params["d_out"]
    w1 = params["w1_row"]              # (1, D_in)
    b1 = params["b1"]                  # (1, 1)
    w2t = params["w2t"][:, :d_out]     # (D_in, D_out)
    b2 = params["b2"][:, :d_out]       # (1, D_out)
    x = x.astype(jnp.float32)
    mask = (jnp.sum(x, axis=2) != 0.0).astype(jnp.float32)         # (B, S)
    scores = (jnp.einsum("bsd,d->bs", x, w1[0]) + b1[0, 0]) * mask  # (B, S)
    exps = jnp.exp(scores)
    masked_exps = exps * mask
    masked_sums = jnp.sum(masked_exps, axis=1, keepdims=True) + 1e-5
    alphas = masked_exps / masked_sums
    pooled = jnp.sum(x * alphas[:, :, None], axis=1)                # (B, D_in)
    return pooled @ w2t + b2                                        # (B, D_out)


if __name__ == "__main__":
    # B is deliberately not a multiple of 8 to exercise the ragged last tile.
    B, S, D_in, D_out = 10, 8, 32, 32
    key = jax.random.PRNGKey(0)
    kx, _ = jax.random.split(key)
    x = jax.random.normal(kx, (B, S, D_in), jnp.float32)
    # Zero out some sequence positions (and one whole sample) so the
    # mask / masked-softmax path is actually exercised.
    x = x.at[0, 3, :].set(0.0)
    x = x.at[2, 5:, :].set(0.0)
    x = x.at[5, :, :].set(0.0)

    params = make_net_a_params(D_in, D_out, seed=0)

    out = jax.block_until_ready(net_a_forward(params, x))
    ref = net_a_reference(params, x)

    assert out.shape == (B, D_out), out.shape
    assert jnp.allclose(out, ref, atol=1e-4, rtol=1e-4), "mismatch vs reference"
    print("KERNEL_OK")
</pallas_src>

<mosaic_0001>
module attributes {stable_mosaic.version = 11 : i64} {
  func.func @net_a_kernel(%arg0: i32, %arg1: memref<16x8x32xf32, #tpu.memory_space<vmem>>, %arg2: memref<1x32xf32, #tpu.memory_space<vmem>>, %arg3: memref<1x1xf32, #tpu.memory_space<vmem>>, %arg4: memref<32x128xf32, #tpu.memory_space<vmem>>, %arg5: memref<1x128xf32, #tpu.memory_space<vmem>>, %arg6: memref<16x128xf32, #tpu.memory_space<vmem>>) attributes {dimension_semantics = [#tpu.dimension_semantics<parallel>], iteration_bounds = array<i64: 1>, scalar_prefetch = 0 : i64, scratch_operands = 0 : i64, tpu.core_type = #tpu.core_type<tc>, window_params = [{transform_indices = @transform_0, window_bounds = array<i64: 16, 8, 32>}, {pipeline_mode = #tpu.pipeline_mode<synchronous>, transform_indices = @transform_1, window_bounds = array<i64: 1, 32>}, {pipeline_mode = #tpu.pipeline_mode<synchronous>, transform_indices = @transform_2, window_bounds = array<i64: 1, 1>}, {pipeline_mode = #tpu.pipeline_mode<synchronous>, transform_indices = @transform_3, window_bounds = array<i64: 32, 128>}, {pipeline_mode = #tpu.pipeline_mode<synchronous>, transform_indices = @transform_4, window_bounds = array<i64: 1, 128>}, {transform_indices = @transform_5, window_bounds = array<i64: 16, 128>}]} {
    %c0 = arith.constant 0 : index
    %c0_0 = arith.constant 0 : index
    %c0_1 = arith.constant 0 : index
    %0 = vector.load %arg1[%c0, %c0_0, %c0_1] : memref<16x8x32xf32, #tpu.memory_space<vmem>>, vector<16x8x32xf32>
    %c0_2 = arith.constant 0 : index
    %c0_3 = arith.constant 0 : index
    %1 = vector.load %arg2[%c0_2, %c0_3] : memref<1x32xf32, #tpu.memory_space<vmem>>, vector<1x32xf32>
    %c0_4 = arith.constant 0 : index
    %c0_5 = arith.constant 0 : index
    %2 = vector.load %arg3[%c0_4, %c0_5] : memref<1x1xf32, #tpu.memory_space<vmem>>, vector<1x1xf32>
    %c0_6 = arith.constant 0 : index
    %c0_7 = arith.constant 0 : index
    %3 = vector.load %arg4[%c0_6, %c0_7] : memref<32x128xf32, #tpu.memory_space<vmem>>, vector<32x128xf32>
    %c0_8 = arith.constant 0 : index
    %c0_9 = arith.constant 0 : index
    %4 = vector.load %arg5[%c0_8, %c0_9] : memref<1x128xf32, #tpu.memory_space<vmem>>, vector<1x128xf32>
    %cst = arith.constant dense<0.000000e+00> : vector<16x8xf32>
    %5 = vector.multi_reduction <add>, %0, %cst [2] : vector<16x8x32xf32> to vector<16x8xf32>
    %cst_10 = arith.constant 0.000000e+00 : f32
    %6 = vector.broadcast %cst_10 : f32 to vector<16x8xf32>
    %7 = arith.cmpf one, %5, %6 : vector<16x8xf32>
    %8 = arith.extui %7 : vector<16x8xi1> to vector<16x8xi32>
    %9 = arith.sitofp %8 : vector<16x8xi32> to vector<16x8xf32>
    %10 = vector.shape_cast %1 : vector<1x32xf32> to vector<1x1x32xf32>
    %11 = vector.broadcast %10 : vector<1x1x32xf32> to vector<16x8x32xf32>
    %12 = arith.mulf %0, %11 : vector<16x8x32xf32>
    %cst_11 = arith.constant dense<0.000000e+00> : vector<16x8xf32>
    %13 = vector.multi_reduction <add>, %12, %cst_11 [2] : vector<16x8x32xf32> to vector<16x8xf32>
    %14 = vector.broadcast %2 : vector<1x1xf32> to vector<16x8xf32>
    %15 = arith.addf %13, %14 : vector<16x8xf32>
    %16 = math.exp %15 : vector<16x8xf32>
    %17 = arith.mulf %16, %9 : vector<16x8xf32>
    %cst_12 = arith.constant dense<0.000000e+00> : vector<16xf32>
    %18 = vector.multi_reduction <add>, %17, %cst_12 [1] : vector<16x8xf32> to vector<16xf32>
    %19 = vector.shape_cast %18 : vector<16xf32> to vector<16x1xf32>
    %cst_13 = arith.constant 9.99999974E-6 : f32
    %20 = vector.broadcast %cst_13 : f32 to vector<16x1xf32>
    %21 = arith.addf %19, %20 : vector<16x1xf32>
    %22 = vector.broadcast %21 : vector<16x1xf32> to vector<16x8xf32>
    %23 = arith.divf %17, %22 : vector<16x8xf32>
    %24 = vector.shape_cast %23 : vector<16x8xf32> to vector<16x8x1xf32>
    %25 = vector.broadcast %24 : vector<16x8x1xf32> to vector<16x8x32xf32>
    %26 = arith.mulf %0, %25 : vector<16x8x32xf32>
    %cst_14 = arith.constant dense<0.000000e+00> : vector<16x32xf32>
    %27 = vector.multi_reduction <add>, %26, %cst_14 [1] : vector<16x8x32xf32> to vector<16x32xf32>
    %cst_15 = arith.constant dense<0.000000e+00> : vector<16x128xf32>
    %28 = tpu.matmul %27, %3, %cst_15 {dimension_numbers = #tpu.dot_dimension_numbers<[1], [0], [0], [1], [0, 0, 1, 1], [], []>} : vector<16x32xf32>, vector<32x128xf32>, vector<16x128xf32> -> vector<16x128xf32>
    %29 = vector.broadcast %4 : vector<1x128xf32> to vector<16x128xf32>
    %30 = arith.addf %28, %29 : vector<16x128xf32>
    %c0_16 = arith.constant 0 : index
    %c0_17 = arith.constant 0 : index
    %31 = vector.load %arg6[%c0_16, %c0_17] : memref<16x128xf32, #tpu.memory_space<vmem>>, vector<16x128xf32>
    tpu.vector_store %arg6[%c0_16, %c0_17], %30 {strides = array<i32>} : memref<16x128xf32, #tpu.memory_space<vmem>>, vector<16x128xf32>,
    return
  }
  func.func @transform_0(%arg0: i32) -> (i32, i32, i32) {
    %c0_i32 = arith.constant 0 : i32
    %c0_i32_0 = arith.constant 0 : i32
    %c0_i32_1 = arith.constant 0 : i32
    return %arg0, %c0_i32, %c0_i32_0 : i32, i32, i32
  }
  func.func @transform_1(%arg0: i32) -> (i32, i32) {
    %c0_i32 = arith.constant 0 : i32
    %c0_i32_0 = arith.constant 0 : i32
    %c0_i32_1 = arith.constant 0 : i32
    return %c0_i32, %c0_i32_0 : i32, i32
  }
  func.func @transform_2(%arg0: i32) -> (i32, i32) {
    %c0_i32 = arith.constant 0 : i32
    %c0_i32_0 = arith.constant 0 : i32
    %c0_i32_1 = arith.constant 0 : i32
    return %c0_i32, %c0_i32_0 : i32, i32
  }
  func.func @transform_3(%arg0: i32) -> (i32, i32) {
    %c0_i32 = arith.constant 0 : i32
    %c0_i32_0 = arith.constant 0 : i32
    %c0_i32_1 = arith.constant 0 : i32
    return %c0_i32, %c0_i32_0 : i32, i32
  }
  func.func @transform_4(%arg0: i32) -> (i32, i32) {
    %c0_i32 = arith.constant 0 : i32
    %c0_i32_0 = arith.constant 0 : i32
    %c0_i32_1 = arith.constant 0 : i32
    return %c0_i32, %c0_i32_0 : i32, i32
  }
  func.func @transform_5(%arg0: i32) -> (i32, i32) {
    %c0_i32 = arith.constant 0 : i32
    %c0_i32_0 = arith.constant 0 : i32
    return %arg0, %c0_i32 : i32, i32
  }
}

</mosaic_0001>

<bundles_post_ra>
// kernel: _net_a_forward.1
= control target key start
LH: loop header
LB: loop body
LE: loop exit
PB: predicated region body
PF: predicated region fallthrough
CT: control target
= control target key end

     0   :  { %s1489_s0 = inlined_call_operand.hbm [shape: f32[10,8,32], index: 0, kind: input, shape index: {}]   ;;  %s1490_s1 = inlined_call_operand.vmem [shape: f32[1,32], index: 1, kind: input, shape index: {}]   ;;  %s1491_s2 = inlined_call_operand.<no memory space> [shape: f32[1,1], index: 2, kind: input, shape index: {}]   ;;  %s1492_s3 = inlined_call_operand.hbm [shape: f32[32,128], index: 3, kind: input, shape index: {}]   ;;  %s1493_s4 = inlined_call_operand.vmem [shape: f32[1,128], index: 4, kind: input, shape index: {}]   ;;  %s1494_s5 = inlined_call_operand.hbm [shape: f32[16,128], index: 5, kind: output, shape index: {}]  }
   0x1   :  { %v10_v0 = vstv %s1491_s2 }
   0x2   :  { %11 = vst [vmem:[#allocation2] sm:$0x1] %v10_v0 }
   0x3   :  { %12 = vsyncpa [#allocation4], 0 }
   0x4   :  { %13 = vsyncpa [#allocation7], 0 }
   0x5   :  { %14 = vsyncpa [#allocation5], 0 }
   0x6   :  { %19 = vsyncadd [#allocation4], 768  ;;  %s1076_s20 = smov [#allocation3]   ;;  %s1004_s24 = scalar_lea.hbm %s1489_s0, 1280 }
   0x7   :  { %s20_s21 = sshll.u32 %s1076_s20, 4  ;;  %p1005_p0 = scmp.ne.s32.totalorder %s1489_s0, %s1004_s24  ;;  %s21_s21 = int_to_ptr.vmem [resolvable:$true] %s20_s21 }
   0x8   :  { %p1008_p1 = scmp.lt.u32.totalorder %s1004_s24, %s1489_s0 }
   0xa   :  { %p1010_p2 = pnand %p1008_p1, %p1005_p0 }
   0xc   :  { %1013 = shalt.err (!%p1010_p2)
}
   0xd   :  { %s1014_s2 = scalar_lea.vmem %s21_s21, 1280  ;;  %s1018_s29 = scalar_lea.vmem %s21_s21, 2048 }
   0xe   :  { %p1015_p3 = scmp.ne.s32.totalorder %s21_s21, %s1014_s2  ;;  %p1019_p4 = scmp.lt.s32.totalorder %s21_s21, %s21_s21 }
   0xf   :  { %p1020_p5 = scmp.lt.s32.totalorder %s1018_s29, %s1014_s2 }
  0x11   :  { %p1021_p6 = por %p1020_p5, %p1019_p4 }
  0x13   :  { %p1022_p7 = pnand %p1021_p6, %p1015_p3 }
  0x15   :  { %1025 = shalt.err (!%p1022_p7)
}
  0x16   :  { %s1077_s30 = smov 128   ;;  %s1078_s6 = smov 8  }
  0x17   :  { %26 = dma.hbm_to_vmem [thread:$0]  %s1489_s0, 1280, %s21_s21, [#allocation4], %s1077_s30, %s1077_s30, %s1078_s6  }
  0x18   :  { %s1079_s9 = smov [#allocation6]   ;;  %s1026_s13 = scalar_lea.hbm %s1492_s3, 512 }
  0x19   :  { %s36_s10 = sshll.u32 %s1079_s9, 4  ;;  %p1027_p8 = scmp.ne.s32.totalorder %s1492_s3, %s1026_s13  ;;  %s37_s10 = int_to_ptr.vmem [resolvable:$true] %s36_s10 }
  0x1a   :  { %p1030_p9 = scmp.lt.u32.totalorder %s1026_s13, %s1492_s3 }
  0x1c   :  { %p1032_p10 = pnand %p1030_p9, %p1027_p8 }
  0x1e   :  { %1035 = shalt.err (!%p1032_p10)
}
  0x1f   :  { %s1036_s18 = scalar_lea.vmem %s37_s10, 512  ;;  %p1041_p12 = scmp.lt.s32.totalorder %s37_s10, %s37_s10 }
  0x20   :  { %p1037_p11 = scmp.ne.s32.totalorder %s37_s10, %s1036_s18  ;;  %p1042_p13 = scmp.lt.s32.totalorder %s1036_s18, %s1036_s18 }
  0x22   :  { %p1043_p0 = por %p1042_p13, %p1041_p12 }
  0x24   :  { %p1044_p1 = pnand %p1043_p0, %p1037_p11 }
  0x26   :  { %1047 = shalt.err (!%p1044_p1)
}
  0x27   :  { %42 = dma.hbm_to_vmem [thread:$0]  %s1492_s3, 512, %s37_s10, [#allocation7], %s1077_s30, %s1077_s30, %s1078_s6  }
  0x28   :  { %1070 = dma.done.wait [#allocation4], 2048  }
  0x29   :  { %1071 = vsyncadd [#allocation4], 4294965248 }
  0x2a   :  { %1072 = dma.done.wait [#allocation7], 512  }
  0x2b   :  { %1073 = vsyncadd [#allocation7], 4294966784  ;;  %v1080_v1 = vmov 0   ;;  %v1146_v2 = vld [vmem:[#allocation3 + $0x10] sm:$0xff]  ;;  %v901_v3 = vld [vmem:[%s1490_s1] ss:$0 sm:$0xff] }
  0x2c   :  { %938 = vset.pattern.permute.xlu0 %v1080_v1  ;;  %939 = vset.pattern.permute.xlu1 %v1080_v1  ;;  %vm74_vm0 = vcmask 261120   ;;  %v1151_v4 = vld [vmem:[#allocation3] sm:$0xff]  ;;  %v179_v5 = vmul.f32 %v901_v3, %v1146_v2  ;;  %v1157_v8 = vld [vmem:[#allocation3 + $0x8] sm:$0xff]  ;;  %v1161_v11 = vld [vmem:[#allocation3 + $0x18] sm:$0xff]  ;;  %vm396_vm4 = vcmask 1041409   ;;  %vm398_vm5 = vcmask 1042434  }
  0x2d   :  { %v177_v6 = vmul.f32 %v901_v3, %v1151_v4  ;;  %v1155_v7 = vld [vmem:[#allocation3 + $0x40] sm:$0xff]  ;;  %v178_v10 = vmul.f32 %v901_v3, %v1157_v8  ;;  %v1163_v12 = vld [vmem:[#allocation3 + $0x48] sm:$0xff]  ;;  %v180_v17 = vmul.f32 %v901_v3, %v1161_v11  ;;  %v1173_v20 = vld [vmem:[#allocation3 + $0x50] sm:$0xff]  ;;  %v75_v51 = vsel %vm74_vm0, %v1151_v4, 0.0  ;;  %s1082_s22 = smov [#allocation8]  }
  0x2e   :  { %v185_v9 = vmul.f32 %v901_v3, %v1155_v7  ;;  %v199_v13 = vsel %vm74_vm0, %v179_v5, 0.0  ;;  %v186_v18 = vmul.f32 %v901_v3, %v1163_v12  ;;  %v1171_v19 = vld [vmem:[#allocation3 + $0x20] sm:$0xff]  ;;  %v187_v24 = vmul.f32 %v901_v3, %v1173_v20  ;;  %v1179_v25 = vld [vmem:[#allocation3 + $0x28] sm:$0xff]  ;;  %v1181_v26 = vld [vmem:[#allocation3 + $0x58] sm:$0xff]  ;;  %s872_s23 = sshll.u32 %s1082_s22, 4  ;;  %s873_s23 = int_to_ptr.vmem [resolvable:$true] %s872_s23 }
  0x2f   :  { %v193_v14 = vsel %vm74_vm0, %v177_v6, 0.0  ;;  %200 = vadd.xlane.f32.xlu1 %v199_v13  ;;  %v196_v16 = vsel %vm74_vm0, %v178_v10, 0.0  ;;  %v202_v21 = vsel %vm74_vm0, %v180_v17, 0.0  ;;  %v181_v23 = vmul.f32 %v901_v3, %v1171_v19  ;;  %v1187_v31 = vld [vmem:[#allocation3 + $0x30] sm:$0xff]  ;;  %v1189_v32 = vld [vmem:[#allocation3 + $0x60] sm:$0xff]  ;;  %v1195_v37 = vld [vmem:[#allocation3 + $0x38] sm:$0xff]  ;;  %p1053_p3 = scmp.lt.s32.totalorder %s873_s23, %s873_s23 }
  0x30   :  { %194 = vadd.xlane.f32.xlu0 %v193_v14  ;;  %v217_v15 = vsel %vm74_vm0, %v185_v9, 0.0  ;;  %v220_v22 = vsel %vm74_vm0, %v186_v18, 0.0  ;;  %v223_v28 = vsel %vm74_vm0, %v187_v24, 0.0  ;;  %v182_v29 = vmul.f32 %v901_v3, %v1179_v25  ;;  %v1197_v38 = vld [vmem:[#allocation3 + $0x68] sm:$0xff]  ;;  %v1203_v43 = vld [vmem:[#allocation3 + $0x78] sm:$0xff]  ;;  %v1205_v44 = vld [vmem:[#allocation3 + $0x70] sm:$0xff] }
  0x31   :  { %v205_v27 = vsel %vm74_vm0, %v181_v23, 0.0  ;;  %v188_v30 = vmul.f32 %v901_v3, %v1181_v26  ;;  %v183_v35 = vmul.f32 %v901_v3, %v1187_v31  ;;  %v189_v36 = vmul.f32 %v901_v3, %v1189_v32  ;;  %v902_v56 = vld [vmem:[#allocation2] ss:$0 sm:$0xff]  ;;  %s1048_s24 = scalar_lea.vmem %s873_s23, 256 }
  0x32   :  { %v208_v33 = vsel %vm74_vm0, %v182_v29, 0.0  ;;  %v184_v41 = vmul.f32 %v901_v3, %v1195_v37  ;;  %v190_v42 = vmul.f32 %v901_v3, %v1197_v38  ;;  %v192_v47 = vmul.f32 %v901_v3, %v1203_v43  ;;  %p1049_p2 = scmp.ne.s32.totalorder %s873_s23, %s1048_s24  ;;  %p1054_p4 = scmp.lt.s32.totalorder %s1048_s24, %s1048_s24 }
  0x33   :  { %218 = vadd.xlane.f32.xlu1 %v217_v15  ;;  %v226_v34 = vsel %vm74_vm0, %v188_v30, 0.0  ;;  %v211_v39 = vsel %vm74_vm0, %v183_v35, 0.0  ;;  %v229_v40 = vsel %vm74_vm0, %v189_v36, 0.0  ;;  %v191_v48 = vmul.f32 %v901_v3, %v1205_v44 }
  0x34   :  { %197 = vadd.xlane.f32.xlu0 %v196_v16  ;;  %v214_v45 = vsel %vm74_vm0, %v184_v41, 0.0  ;;  %v232_v46 = vsel %vm74_vm0, %v190_v42, 0.0  ;;  %v238_v49 = vsel %vm74_vm0, %v192_v47, 0.0  ;;  %v78_v52 = vsel %vm74_vm0, %v1157_v8, 0.0  ;;  %p1055_p5 = por %p1054_p4, %p1053_p3 }
  0x35   :  { %v235_v50 = vsel %vm74_vm0, %v191_v48, 0.0  ;;  %v81_v53 = vsel %vm74_vm0, %v1146_v2, 0.0  ;;  %v99_v54 = vsel %vm74_vm0, %v1155_v7, 0.0  ;;  %v102_v55 = vsel %vm74_vm0, %v1163_v12, 0.0 }
  0x36   :  { %v84_v57 = vsel %vm74_vm0, %v1161_v11, 0.0  ;;  %v105_v58 = vsel %vm74_vm0, %v1173_v20, 0.0  ;;  %v87_v59 = vsel %vm74_vm0, %v1171_v19, 0.0  ;;  %v108_v60 = vsel %vm74_vm0, %v1181_v26, 0.0  ;;  %p1056_p6 = pnand %p1055_p5, %p1049_p2 }
  0x37   :  { %203 = vadd.xlane.f32.xlu1 %v202_v21  ;;  %v90_v61 = vsel %vm74_vm0, %v1179_v25, 0.0  ;;  %v111_v62 = vsel %vm74_vm0, %v1189_v32, 0.0  ;;  %v114_v63 = vsel %vm74_vm0, %v1197_v38, 0.0  ;;  %v96_v0 = vsel %vm74_vm0, %v1195_v37, 0.0 }
  0x38   :  { %221 = vadd.xlane.f32.xlu0 %v220_v22  ;;  %v93_v1 = vsel %vm74_vm0, %v1187_v31, 0.0  ;;  %v117_v3 = vsel %vm74_vm0, %v1205_v44, 0.0  ;;  %v120_v5 = vsel %vm74_vm0, %v1203_v43, 0.0  ;;  %vm400_vm10 = vcmask 1043459  }
  0x39   :  { %vm402_vm13 = vcmask 1044484   ;;  %vm404_vm14 = vcmask 1045509  }
  0x3b   :  { %206 = vadd.xlane.f32.xlu1 %v205_v27 }
  0x3c   :  { %224 = vadd.xlane.f32.xlu0 %v223_v28 }
  0x3f   :  { %209 = vadd.xlane.f32.xlu1 %v208_v33 }
  0x40   :  { %227 = vadd.xlane.f32.xlu0 %v226_v34 }
  0x43   :  { %212 = vadd.xlane.f32.xlu1 %v211_v39 }
  0x44   :  { %230 = vadd.xlane.f32.xlu0 %v229_v40 }
  0x47   :  { %215 = vadd.xlane.f32.xlu1 %v214_v45 }
  0x48   :  { %233 = vadd.xlane.f32.xlu0 %v232_v46 }
  0x4b   :  { %239 = vadd.xlane.f32.xlu1 %v238_v49 }
  0x4c   :  { %236 = vadd.xlane.f32.xlu0 %v235_v50 }
  0x4f   :  { %76 = vadd.xlane.f32.xlu1 %v75_v51 }
  0x53   :  { %79 = vadd.xlane.f32.xlu1 %v78_v52  ;;  %v330_v52 = vlaneseq }
  0x57   :  { %82 = vadd.xlane.f32.xlu1 %v81_v53 }
  0x5b   :  { %100 = vadd.xlane.f32.xlu1 %v99_v54 }
  0x5f   :  { %103 = vadd.xlane.f32.xlu1 %v102_v55 }
  0x62   :  { %247 = vperm.xlu0 %938, %v902_v56  }
  0x63   :  { %85 = vadd.xlane.f32.xlu1 %v84_v57 }
  0x67   :  { %106 = vadd.xlane.f32.xlu1 %v105_v58 }
  0x6b   :  { %88 = vadd.xlane.f32.xlu1 %v87_v59 }
  0x6f   :  { %109 = vadd.xlane.f32.xlu1 %v108_v60  ;;  %v331_v60 = vand.u32 127, %v330_v52 }
  0x73   :  { %91 = vadd.xlane.f32.xlu1 %v90_v61  ;;  %v1270_v61 = vshrl.u32 %v330_v52, 7 }
  0x77   :  { %112 = vadd.xlane.f32.xlu1 %v111_v62 }
  0x7b   :  { %115 = vadd.xlane.f32.xlu1 %v114_v63 }
  0x7f   :  { %97 = vadd.xlane.f32.xlu1 %v96_v0 }
  0x81   :  { %94 = vadd.xlane.f32.xlu0 %v93_v1 }
  0x83   :  { %118 = vadd.xlane.f32.xlu1 %v117_v3 }
  0x87   :  { %121 = vadd.xlane.f32.xlu1 %v120_v5 }
  0xbc   :  { %v201_v6 = vpop.xlane.xlu1 %200 }
  0xbd   :  { %v195_v9 = vpop.xlane.xlu0 %194 }
  0xc0   :  { %v219_v10 = vpop.xlane.xlu1 %218 }
  0xc1   :  { %v198_v13 = vpop.xlane.xlu0 %197 }
  0xc4   :  { %v204_v14 = vpop.xlane.xlu1 %203 }
  0xc5   :  { %v222_v15 = vpop.xlane.xlu0 %221 }
  0xc8   :  { %v207_v16 = vpop.xlane.xlu1 %206 }
  0xc9   :  { %v225_v17 = vpop.xlane.xlu0 %224 }
  0xcc   :  { %v210_v18 = vpop.xlane.xlu1 %209 }
  0xcd   :  { %v228_v22 = vpop.xlane.xlu0 %227 }
  0xd0   :  { %v213_v21 = vpop.xlane.xlu1 %212 }
  0xd1   :  { %v231_v24 = vpop.xlane.xlu0 %230 }
  0xd4   :  { %v216_v23 = vpop.xlane.xlu1 %215 }
  0xd5   :  { %v234_v29 = vpop.xlane.xlu0 %233 }
  0xd8   :  { %v1245_v27 = vpop.xlane.xlu1 %239 }
  0xd9   :  { %v237_v33 = vpop.xlane.xlu0 %236 }
  0xdc   :  { %v77_v28 = vpop.xlane.xlu1 %76 }
  0xdd   :  { %vm123_vm1 = vcmp.ne.f32.partialorder %v77_v28, 0.0 }
  0xe0   :  { %v80_v30 = vpop.xlane.xlu1 %79 }
  0xe1   :  { %v1249_v35 = vpop.permute.xlu0 %247  ;;  %vm124_vm2 = vcmp.ne.f32.partialorder %v80_v30, 0.0 }
  0xe2   :  { %v250_v39 = vadd.f32 %v1249_v35, %v195_v9  ;;  %v251_v40 = vadd.f32 %v1249_v35, %v198_v13  ;;  %v252_v45 = vadd.f32 %v1249_v35, %v201_v6  ;;  %v258_v49 = vadd.f32 %v1249_v35, %v219_v10 }
  0xe3   :  { %v259_v51 = vadd.f32 %v1249_v35, %v222_v15  ;;  %v253_v53 = vadd.f32 %v1249_v35, %v204_v14  ;;  %v254_v54 = vadd.f32 %v1249_v35, %v207_v16  ;;  %v255_v57 = vadd.f32 %v1249_v35, %v210_v18 }
  0xe4   :  { %v1247_v34 = vpop.xlane.xlu1 %82  ;;  %v266_v42 = vmul.f32 1.442695, %v250_v39  ;;  %v268_v46 = vmul.f32 1.442695, %v251_v40  ;;  %v270_v48 = vmul.f32 1.442695, %v252_v45  ;;  %v260_v59 = vadd.f32 %v1249_v35, %v225_v17 }
  0xe5   :  { %v282_v55 = vmul.f32 1.442695, %v258_v49  ;;  %v284_v58 = vmul.f32 1.442695, %v259_v51  ;;  %v272_v62 = vmul.f32 1.442695, %v253_v53  ;;  %v261_v63 = vadd.f32 %v1249_v35, %v228_v22 }
  0xe6   :  { %940 = vpow2.f32 %v266_v42  ;;  %v274_v0 = vmul.f32 1.442695, %v254_v54  ;;  %v262_v1 = vadd.f32 %v1249_v35, %v231_v24  ;;  %v276_v5 = vmul.f32 1.442695, %v255_v57 }
  0xe7   :  { %942 = vpow2.f32 %v268_v46  ;;  %v257_v6 = vadd.f32 %v1249_v35, %v216_v23  ;;  %v286_v10 = vmul.f32 1.442695, %v260_v59  ;;  %v256_v13 = vadd.f32 %v1249_v35, %v213_v21 }
  0xe8   :  { %v1251_v36 = vpop.xlane.xlu1 %100  ;;  %944 = vpow2.f32 %v270_v48  ;;  %v1279_v15 = vsub.s32 %v331_v60, %v1270_v61  ;;  %v288_v16 = vmul.f32 1.442695, %v261_v63  ;;  %v263_v17 = vadd.f32 %v1249_v35, %v234_v29 }
  0xe9   :  { %946 = vpow2.f32 %v282_v55  ;;  %v1081_v18 = vmov 0.0   ;;  %v290_v24 = vmul.f32 1.442695, %v262_v1  ;;  %vm125_vm3 = vcmp.ne.f32.partialorder %v1247_v34, 0.0 }
  0xea   :  { %948 = vpow2.f32 %v284_v58  ;;  %v885_v22 = vsel %vm123_vm1, 1.0, %v1081_v18  ;;  %v886_v23 = vsel %vm124_vm2, 1.0, %v1081_v18  ;;  %v280_v39 = vmul.f32 1.442695, %v257_v6 }
  0xeb   :  { %950 = vpow2.f32 %v272_v62  ;;  %v264_v40 = vadd.f32 %v1249_v35, %v237_v33  ;;  %v278_v28 = vmul.f32 1.442695, %v256_v13  ;;  %v292_v30 = vmul.f32 1.442695, %v263_v17 }
  0xec   :  { %v1255_v41 = vpop.xlane.xlu1 %103  ;;  %952 = vpow2.f32 %v274_v0  ;;  %v887_v46 = vsel %vm125_vm3, 1.0, %v1081_v18  ;;  %v265_v34 = vadd.f32 %v1249_v35, %v1245_v27  ;;  %vm131_vm11 = vcmp.ne.f32.partialorder %v1251_v36, 0.0 }
  0xed   :  { %954 = vpow2.f32 %v276_v5  ;;  %v294_v49 = vmul.f32 1.442695, %v264_v40  ;;  %vm132_vm9 = vcmp.ne.f32.partialorder %v1255_v41, 0.0  ;;  %vm406_vm1 = vcmask 1046534  }
  0xee   :  { %956 = vpow2.f32 %v286_v10  ;;  %v296_v59 = vmul.f32 1.442695, %v265_v34  ;;  %v894_v63 = vsel %vm132_vm9, 1.0, %v1081_v18  ;;  %v893_v1 = vsel %vm131_vm11, 1.0, %v1081_v18 }
  0xef   :  { %958 = vpow2.f32 %v288_v16  ;;  %vm419_vm9 = vcmask 64512  }
  0xf0   :  { %v1258_v47 = vpop.xlane.xlu1 %85  ;;  %v941_v9 = vpop.eup %940  ;;  %960 = vpow2.f32 %v290_v24 }
  0xf1   :  { %v943_v14 = vpop.eup %942  ;;  %v1288_v45 = vmul.f32 %v941_v9, %v885_v22  ;;  %vm126_vm6 = vcmp.ne.f32.partialorder %v1258_v47, 0.0  ;;  %962 = vpow2.f32 %v280_v39 }
  0xf2   :  { %v945_v42 = vpop.eup %944  ;;  %v1290_v29 = vmul.f32 %v943_v14, %v886_v23  ;;  %964 = vpow2.f32 %v278_v28  ;;  %v888_v27 = vsel %vm126_vm6, 1.0, %v1081_v18  ;;  %vm408_vm6 = vcmask 1047559  }
  0xf3   :  { %v1296_v33 = vmul.f32 %v945_v42, %v887_v46  ;;  %v335_v51 = vrot.slane %v1288_v45, %v1279_v15  ;;  %v947_v47 = vpop.eup %946  ;;  %966 = vpow2.f32 %v292_v30 }
  0xf4   :  { %v1261_v50 = vpop.xlane.xlu1 %106  ;;  %v339_v52 = vrot.slane %v1290_v29, %v1279_v15  ;;  %v949_v35 = vpop.eup %948  ;;  %968 = vpow2.f32 %v294_v49  ;;  %v1328_v41 = vmul.f32 %v947_v47, %v893_v1 }
  0xf5   :  { %vm133_vm12 = vcmp.ne.f32.partialorder %v1261_v50, 0.0  ;;  %v951_v54 = vpop.eup %950  ;;  %v343_v55 = vrot.slane %v1296_v33, %v1279_v15  ;;  %v1333_v14 = vmul.f32 %v949_v35, %v894_v63  ;;  %970 = vpow2.f32 %v296_v59 }
  0xf6   :  { %v953_v60 = vpop.eup %952  ;;  %v397_v62 = vsel %vm396_vm4, %v339_v52, %v335_v51  ;;  %v895_v5 = vsel %vm133_vm12, 1.0, %v1081_v18  ;;  %v367_v51 = vrot.slane %v1328_v41, %v1279_v15 }
  0xf7   :  { %v955_v0 = vpop.eup %954  ;;  %v399_v13 = vsel %vm398_vm5, %v343_v55, %v397_v62  ;;  %v371_v35 = vrot.slane %v1333_v14, %v1279_v15 }
  0xf8   :  { %v1266_v56 = vpop.xlane.xlu1 %88  ;;  %v957_v9 = vpop.eup %956 }
  0xf9   :  { %vm127_vm7 = vcmp.ne.f32.partialorder %v1266_v56, 0.0  ;;  %v1317_v56 = vmul.f32 %v951_v54, %v888_v27  ;;  %v1338_v22 = vmul.f32 %v957_v9, %v895_v5 }
  0xfa   :  { %v889_v53 = vsel %vm127_vm7, 1.0, %v1081_v18 }
  0xfb   :  { %v1326_v6 = vmul.f32 %v953_v60, %v889_v53  ;;  %v347_v17 = vrot.slane %v1317_v56, %v1279_v15 }
  0xfc   :  { %v1274_v3 = vpop.xlane.xlu1 %109 }
  0xfd   :  { %vm134_vm15 = vcmp.ne.f32.partialorder %v1274_v3, 0.0  ;;  %v959_v3 = vpop.eup %958  ;;  %v351_v39 = vrot.slane %v1326_v6, %v1279_v15  ;;  %v401_v53 = vsel %vm400_vm10, %v347_v17, %v399_v13  ;;  %v410_v13 = vsel %vm396_vm4, %v371_v35, %v367_v51 }
  0xfe   :  { %v896_v36 = vsel %vm134_vm15, 1.0, %v1081_v18  ;;  %v961_v50 = vpop.eup %960  ;;  %v436_v51 = vsub.s32 1, %v1270_v61  ;;  %v444_v35 = vsub.s32 3, %v1270_v61 }
  0xff   :  { %v1346_v30 = vmul.f32 %v959_v3, %v896_v36  ;;  %v403_v60 = vsel %vm402_vm13, %v351_v39, %v401_v53 }
 0x100   :  { %v92_v21 = vpop.xlane.xlu1 %91 }
 0x101   :  { %vm128_vm8 = vcmp.ne.f32.partialorder %v92_v21, 0.0  ;;  %v963_v21 = vpop.eup %962  ;;  %v379_v62 = vrot.slane %v1346_v30, %v1279_v15 }
 0x102   :  { %v890_v57 = vsel %vm128_vm8, 1.0, %v1081_v18  ;;  %v965_v28 = vpop.eup %964 }
 0x103   :  { %v1330_v10 = vmul.f32 %v955_v0, %v890_v57  ;;  %v967_v49 = vpop.eup %966  ;;  %v375_v57 = vrot.slane %v1338_v22, %v1279_v15 }
 0x104   :  { %v113_v48 = vpop.xlane.xlu1 %112  ;;  %v969_v55 = vpop.eup %968 }
 0x105   :  { %vm135_vm2 = vcmp.ne.f32.partialorder %v113_v48, 0.0  ;;  %v355_v46 = vrot.slane %v1330_v10, %v1279_v15  ;;  %v411_v17 = vsel %vm398_vm5, %v375_v57, %v410_v13 }
 0x106   :  { %v897_v23 = vsel %vm135_vm2, 1.0, %v1081_v18  ;;  %v412_v39 = vsel %vm400_vm10, %v379_v62, %v411_v17 }
 0x107   :  { %v1355_v52 = vmul.f32 %v961_v50, %v897_v23  ;;  %v405_v1 = vsel %vm404_vm14, %v355_v46, %v403_v60  ;;  %v971_v50 = vpop.eup %970  ;;  %v448_v60 = vsub.s32 4, %v1270_v61 }
 0x108   :  { %v116_v58 = vpop.xlane.xlu1 %115 }
 0x109   :  { %vm136_vm3 = vcmp.ne.f32.partialorder %v116_v58, 0.0  ;;  %v383_v5 = vrot.slane %v1355_v52, %v1279_v15 }
 0x10a   :  { %v898_v40 = vsel %vm136_vm3, 1.0, %v1081_v18 }
 0x10b   :  { %v1362_v54 = vmul.f32 %v967_v49, %v898_v40 }
 0x10c   :  { %v98_v16 = vpop.xlane.xlu1 %97 }
 0x10d   :  { %vm130_vm7 = vcmp.ne.f32.partialorder %v98_v16, 0.0  ;;  %v387_v36 = vrot.slane %v1362_v54, %v1279_v15 }
 0x10e   :  { %v95_v24 = vpop.xlane.xlu0 %94  ;;  %v892_v42 = vsel %vm130_vm7, 1.0, %v1081_v18 }
 0x10f   :  { %vm129_vm8 = vcmp.ne.f32.partialorder %v95_v24, 0.0  ;;  %v1350_v34 = vmul.f32 %v963_v21, %v892_v42  ;;  %v413_v42 = vsel %vm402_vm13, %v383_v5, %v412_v39 }
 0x110   :  { %v891_v48 = vsel %vm129_vm8, 1.0, %v1081_v18  ;;  %v119_v27 = vpop.xlane.xlu1 %118  ;;  %v414_v46 = vsel %vm404_vm14, %v387_v36, %v413_v42  ;;  %v456_v36 = vsub.s32 6, %v1270_v61 }
 0x111   :  { %v1357_v47 = vmul.f32 %v965_v28, %v891_v48  ;;  %vm137_vm11 = vcmp.ne.f32.partialorder %v119_v27, 0.0  ;;  %v363_v63 = vrot.slane %v1350_v34, %v1279_v15  ;;  %v432_v27 = vsub.s32 0, %v1270_v61 }
 0x112   :  { %v899_v59 = vsel %vm137_vm11, 1.0, %v1081_v18 }
 0x113   :  { %v359_v58 = vrot.slane %v1357_v47, %v1279_v15  ;;  %v1374_v0 = vmul.f32 %v969_v55, %v899_v59  ;;  %v440_v55 = vsub.s32 2, %v1270_v61 }
 0x114   :  { %v122_v9 = vpop.xlane.xlu1 %121 }
 0x115   :  { %v407_v3 = vsel %vm406_vm1, %v359_v58, %v405_v1  ;;  %vm138_vm12 = vcmp.ne.f32.partialorder %v122_v9, 0.0  ;;  %v391_v23 = vrot.slane %v1374_v0, %v1279_v15  ;;  %v452_v9 = vsub.s32 5, %v1270_v61 }
 0x116   :  { %v409_v16 = vsel %vm408_vm6, %v363_v63, %v407_v3  ;;  %v900_v24 = vsel %vm138_vm12, 1.0, %v1081_v18 }
 0x117   :  { %v420_v21 = vsel %vm419_vm9, %v409_v16, 0.0  ;;  %v1390_v40 = vmul.f32 %v971_v50, %v900_v24  ;;  %v415_v48 = vsel %vm406_vm1, %v391_v23, %v414_v46  ;;  %v460_v23 = vsub.s32 7, %v1270_v61 }
 0x118   :  { %421 = vadd.xlane.f32.xlu1 %v420_v21 }
 0x119   :  { %v395_v28 = vrot.slane %v1390_v40, %v1279_v15 }
 0x11b   :  { %v416_v49 = vsel %vm408_vm6, %v395_v28, %v415_v48 }
 0x11c   :  { %v423_v18 = vsel %vm419_vm9, %v416_v49, 0.0 }
 0x11d   :  { %424 = vadd.xlane.f32.xlu1 %v423_v18 }
 0x1a5   :  { %v422_v53 = vpop.xlane.xlu1 %421 }
 0x1a6   :  { %v426_v57 = vadd.f32 1e-05, %v422_v53 }
 0x1a8   :  { %v437_v15 = vrot.slane %v426_v57, %v436_v51  ;;  %v433_v58 = vrot.slane %v426_v57, %v432_v27  ;;  %v445_v59 = vrot.slane %v426_v57, %v444_v35  ;;  %v441_v62 = vrot.slane %v426_v57, %v440_v55 }
 0x1a9   :  { %v449_v5 = vrot.slane %v426_v57, %v448_v60  ;;  %v453_v13 = vrot.slane %v426_v57, %v452_v9  ;;  %v457_v17 = vrot.slane %v426_v57, %v456_v36  ;;  %v461_v48 = vrot.slane %v426_v57, %v460_v23 }
 0x1aa   :  { %972 = vrcp.f32 %v437_v15  ;;  %v425_v63 = vpop.xlane.xlu1 %424 }
 0x1ab   :  { %974 = vrcp.f32 %v433_v58  ;;  %v427_v1 = vadd.f32 1e-05, %v425_v63 }
 0x1ac   :  { %976 = vrcp.f32 %v445_v59 }
 0x1ad   :  { %978 = vrcp.f32 %v441_v62  ;;  %v465_v3 = vrot.slane %v427_v1, %v432_v27  ;;  %v469_v16 = vrot.slane %v427_v1, %v436_v51  ;;  %v473_v39 = vrot.slane %v427_v1, %v440_v55 }
 0x1ae   :  { %980 = vrcp.f32 %v449_v5  ;;  %v477_v18 = vrot.slane %v427_v1, %v444_v35 }
 0x1af   :  { %982 = vrcp.f32 %v465_v3 }
 0x1b0   :  { %984 = vrcp.f32 %v453_v13 }
 0x1b1   :  { %986 = vrcp.f32 %v469_v16  ;;  %v70_v16 = vld [vmem:[#allocation6 + $0x8] sm:$0xff] }
 0x1b2   :  { %988 = vrcp.f32 %v457_v17  ;;  %v72_v17 = vld [vmem:[#allocation6 + $0x18] sm:$0xff] }
 0x1b3   :  { %990 = vrcp.f32 %v473_v39 }
 0x1b4   :  { %v973_v50 = vpop.eup %972  ;;  %992 = vrcp.f32 %v461_v48 }
 0x1b5   :  { %v975_v24 = vpop.eup %974  ;;  %v513_v21 = vmul.f32 %v973_v50, %v1290_v29  ;;  %v493_v29 = vrot.slane %v427_v1, %v460_v23  ;;  %994 = vrcp.f32 %v477_v18 }
 0x1b6   :  { %v977_v42 = vpop.eup %976  ;;  %v511_v28 = vmul.f32 %v975_v24, %v1288_v45  ;;  %v481_v45 = vrot.slane %v427_v1, %v448_v60  ;;  %v489_v60 = vrot.slane %v427_v1, %v456_v36  ;;  %v69_v36 = vld [vmem:[#allocation6] sm:$0xff] }
 0x1b7   :  { %v979_v46 = vpop.eup %978  ;;  %549 = vperm.xlu0 %938, %v513_v21   ;;  %v517_v49 = vmul.f32 %v977_v42, %v1317_v56  ;;  %996 = vrcp.f32 %v493_v29  ;;  %v923_v50 = vpack.c.bf16 %v70_v16, %v69_v36 }
 0x1b8   :  { %544 = vperm.xlu1 %939, %v511_v28   ;;  %v981_v51 = vpop.eup %980  ;;  %v515_v61 = vmul.f32 %v979_v46, %v1296_v33  ;;  %998 = vrcp.f32 %v481_v45  ;;  %v485_v33 = vrot.slane %v427_v1, %v452_v9 }
 0x1b9   :  { %v983_v27 = vpop.eup %982  ;;  %v519_v53 = vmul.f32 %v981_v51, %v1326_v6  ;;  %924 = vmatprep.subr.bf16.mxu0 %v923_v50 }
 0x1ba   :  { %v985_v55 = vpop.eup %984  ;;  %v527_v15 = vmul.f32 %v983_v27, %v1328_v41  ;;  %1000 = vrcp.f32 %v485_v33  ;;  %926 = vmatpush3.bf16.msra.mxu0 %v923_v50 }
 0x1bb   :  { %559 = vperm.xlu0 %938, %v517_v49   ;;  %v987_v57 = vpop.eup %986  ;;  %v521_v56 = vmul.f32 %v985_v55, %v1330_v10  ;;  %1002 = vrcp.f32 %v489_v60 }
 0x1bc   :  { %554 = vperm.xlu1 %939, %v515_v61   ;;  %v989_v35 = vpop.eup %988  ;;  %v529_v58 = vmul.f32 %v987_v57, %v1333_v14 }
 0x1bd   :  { %v991_v59 = vpop.eup %990  ;;  %v523_v6 = vmul.f32 %v989_v35, %v1357_v47 }
 0x1be   :  { %v993_v62 = vpop.eup %992  ;;  %v531_v41 = vmul.f32 %v991_v59, %v1338_v22 }
 0x1bf   :  { %564 = vperm.xlu0 %938, %v519_v53   ;;  %v995_v63 = vpop.eup %994  ;;  %v525_v10 = vmul.f32 %v993_v62, %v1350_v34 }
 0x1c0   :  { %584 = vperm.xlu1 %939, %v527_v15   ;;  %v533_v9 = vmul.f32 %v995_v63, %v1346_v30  ;;  %v71_v30 = vld [vmem:[#allocation6 + $0x10] sm:$0xff] }
 0x1c1   :  { %v997_v5 = vpop.eup %996  ;;  %v927_v23 = vpack.c.bf16 %v72_v17, %v71_v30 }
 0x1c2   :  { %v999_v14 = vpop.eup %998  ;;  %v541_v3 = vmul.f32 %v997_v5, %v1390_v40 }
 0x1c3   :  { %569 = vperm.xlu0 %938, %v521_v56   ;;  %v535_v47 = vmul.f32 %v999_v14, %v1355_v52  ;;  %928 = vmatprep.subr.bf16.mxu0 %v927_v23 }
 0x1c4   :  { %589 = vperm.xlu1 %939, %v529_v58   ;;  %v1001_v1 = vpop.eup %1000  ;;  %930 = vmatpush3.bf16.msra.mxu0 %v927_v23 }
 0x1c5   :  { %v537_v22 = vmul.f32 %v1001_v1, %v1362_v54  ;;  %v1003_v13 = vpop.eup %1002 }
 0x1c6   :  { %v539_v34 = vmul.f32 %v1003_v13, %v1374_v0 }
 0x1c7   :  { %574 = vperm.xlu0 %938, %v523_v6  }
 0x1c8   :  { %594 = vperm.xlu1 %939, %v531_v41  }
 0x1cb   :  { %579 = vperm.xlu0 %938, %v525_v10  }
 0x1cc   :  { %599 = vperm.xlu1 %939, %v533_v9  }
 0x1cf   :  { %619 = vperm.xlu0 %938, %v541_v3  }
 0x1d0   :  { %604 = vperm.xlu1 %939, %v535_v47  }
 0x1d4   :  { %609 = vperm.xlu1 %939, %v537_v22  }
 0x1d8   :  { %614 = vperm.xlu1 %939, %v539_v34  }
 0x236   :  { %v550_v52 = vpop.permute.xlu0 %549 }
 0x237   :  { %v623_v40 = vmul.f32 %v550_v52, %v1157_v8  ;;  %v545_v24 = vpop.permute.xlu1 %544 }
 0x238   :  { %v622_v54 = vmul.f32 %v545_v24, %v1151_v4 }
 0x239   :  { %v645_v21 = vsel %vm74_vm0, %v623_v40, 0.0 }
 0x23a   :  { %v646_v0 = vrot.slane %v645_v21, 4  ;;  %v638_v39 = vsel %vm74_vm0, %v622_v54, 0.0  ;;  %v560_v42 = vpop.permute.xlu0 %559 }
 0x23b   :  { %v639_v28 = vrot.slane %v638_v39, 4  ;;  %v625_v46 = vmul.f32 %v560_v42, %v1161_v11  ;;  %v555_v48 = vpop.permute.xlu1 %554 }
 0x23c   :  { %v647_v49 = vadd.f32 %v646_v0, %v645_v21  ;;  %v624_v18 = vmul.f32 %v555_v48, %v1146_v2 }
 0x23d   :  { %v640_v51 = vadd.f32 %v639_v28, %v638_v39  ;;  %v659_v61 = vsel %vm74_vm0, %v625_v46, 0.0 }
 0x23e   :  { %v648_v8 = vrot.slane %v647_v49, 2  ;;  %v660_v27 = vrot.slane %v659_v61, 4  ;;  %v652_v4 = vsel %vm74_vm0, %v624_v18, 0.0  ;;  %v565_v29 = vpop.permute.xlu0 %564 }
 0x23f   :  { %v641_v53 = vrot.slane %v640_v51, 2  ;;  %v653_v45 = vrot.slane %v652_v4, 4  ;;  %v626_v55 = vmul.f32 %v565_v29, %v1171_v19  ;;  %v585_v15 = vpop.permute.xlu1 %584 }
 0x240   :  { %v661_v57 = vadd.f32 %v660_v27, %v659_v61  ;;  %v630_v11 = vmul.f32 %v585_v15, %v1155_v7  ;;  %v649_v56 = vadd.f32 %v648_v8, %v647_v49 }
 0x241   :  { %v642_v33 = vadd.f32 %v641_v53, %v640_v51  ;;  %v654_v35 = vadd.f32 %v653_v45, %v652_v4  ;;  %v666_v2 = vsel %vm74_vm0, %v626_v55, 0.0 }
 0x242   :  { %v667_v58 = vrot.slane %v666_v2, 4  ;;  %v570_v59 = vpop.permute.xlu0 %569  ;;  %v662_v6 = vrot.slane %v661_v57, 2  ;;  %v694_v60 = vsel %vm74_vm0, %v630_v11, 0.0  ;;  %v650_v10 = vrot.slane %v649_v56, 1 }
 0x243   :  { %v627_v62 = vmul.f32 %v570_v59, %v1179_v25  ;;  %v590_v41 = vpop.permute.xlu1 %589  ;;  %v655_v63 = vrot.slane %v654_v35, 2  ;;  %v643_v5 = vrot.slane %v642_v33, 1  ;;  %v695_v14 = vrot.slane %v694_v60, 4 }
 0x244   :  { %v631_v19 = vmul.f32 %v590_v41, %v1163_v12  ;;  %v668_v9 = vadd.f32 %v667_v58, %v666_v2  ;;  %v663_v22 = vadd.f32 %v662_v6, %v661_v57  ;;  %v651_v30 = vadd.f32 %v650_v10, %v649_v56 }
 0x245   :  { %v673_v7 = vsel %vm74_vm0, %v627_v62, 0.0  ;;  %v656_v34 = vadd.f32 %v655_v63, %v654_v35  ;;  %v644_v50 = vadd.f32 %v643_v5, %v642_v33  ;;  %v696_v23 = vadd.f32 %v695_v14, %v694_v60 }
 0x246   :  { %v674_v3 = vrot.slane %v673_v7, 4  ;;  %v701_v47 = vsel %vm74_vm0, %v631_v19, 0.0  ;;  %v575_v1 = vpop.permute.xlu0 %574  ;;  %v669_v12 = vrot.slane %v668_v9, 2  ;;  %v664_v54 = vrot.slane %v663_v22, 1 }
 0x247   :  { %v595_v13 = vpop.permute.xlu1 %594  ;;  %v702_v16 = vrot.slane %v701_v47, 4  ;;  %v628_v25 = vmul.f32 %v575_v1, %v1187_v31  ;;  %v657_v42 = vrot.slane %v656_v34, 1  ;;  %v772_v48 = vsel %vm396_vm4, %v651_v30, %v644_v50 }
 0x248   :  { %v675_v36 = vadd.f32 %v674_v3, %v673_v7  ;;  %v632_v17 = vmul.f32 %v595_v13, %v1173_v20  ;;  %v670_v49 = vadd.f32 %v669_v12, %v668_v9  ;;  %v697_v51 = vrot.slane %v696_v23, 2 }
 0x249   :  { %v680_v40 = vsel %vm74_vm0, %v628_v25, 0.0  ;;  %v703_v28 = vadd.f32 %v702_v16, %v701_v47  ;;  %v665_v29 = vadd.f32 %v664_v54, %v663_v22  ;;  %v658_v57 = vadd.f32 %v657_v42, %v656_v34 }
 0x24a   :  { %v676_v52 = vrot.slane %v675_v36, 2  ;;  %v580_v24 = vpop.permute.xlu0 %579  ;;  %v681_v21 = vrot.slane %v680_v40, 4  ;;  %v708_v0 = vsel %vm74_vm0, %v632_v17, 0.0  ;;  %v671_v33 = vrot.slane %v670_v49, 1 }
 0x24b   :  { %v600_v39 = vpop.permute.xlu1 %599  ;;  %v709_v46 = vrot.slane %v708_v0, 4  ;;  %v629_v31 = vmul.f32 %v580_v24, %v1195_v37  ;;  %v704_v37 = vrot.slane %v703_v28, 2  ;;  %v698_v62 = vadd.f32 %v697_v51, %v696_v23 }
 0x24c   :  { %v682_v18 = vadd.f32 %v681_v21, %v680_v40  ;;  %v633_v20 = vmul.f32 %v600_v39, %v1181_v26  ;;  %v677_v61 = vadd.f32 %v676_v52, %v675_v36  ;;  %v672_v14 = vadd.f32 %v671_v33, %v670_v49 }
 0x24d   :  { %v710_v8 = vadd.f32 %v709_v46, %v708_v0  ;;  %v687_v27 = vsel %vm74_vm0, %v629_v31, 0.0  ;;  %v705_v5 = vadd.f32 %v704_v37, %v703_v28  ;;  %v699_v49 = vrot.slane %v698_v62, 1 }
 0x24e   :  { %v620_v4 = vpop.permute.xlu0 %619  ;;  %v683_v53 = vrot.slane %v682_v18, 2  ;;  %v688_v45 = vrot.slane %v687_v27, 4  ;;  %v715_v55 = vsel %vm74_vm0, %v633_v20, 0.0  ;;  %v678_v58 = vrot.slane %v677_v61, 1 }
 0x24f   :  { %v605_v15 = vpop.permute.xlu1 %604  ;;  %v716_v11 = vrot.slane %v715_v55, 4  ;;  %v637_v56 = vmul.f32 %v620_v4, %v1203_v43  ;;  %v711_v59 = vrot.slane %v710_v8, 2  ;;  %v706_v12 = vrot.slane %v705_v5, 1 }
 0x250   :  { %v684_v35 = vadd.f32 %v683_v53, %v682_v18  ;;  %v689_v26 = vadd.f32 %v688_v45, %v687_v27  ;;  %v634_v2 = vmul.f32 %v605_v15, %v1189_v32  ;;  %v773_v32 = vsel %vm398_vm5, %v658_v57, %v772_v48 }
 0x251   :  { %v717_v6 = vadd.f32 %v716_v11, %v715_v55  ;;  %v743_v60 = vsel %vm74_vm0, %v637_v56, 0.0  ;;  %v679_v1 = vadd.f32 %v678_v58, %v677_v61  ;;  %v712_v22 = vadd.f32 %v711_v59, %v710_v8 }
 0x252   :  { %v685_v41 = vrot.slane %v684_v35, 1  ;;  %v690_v63 = vrot.slane %v689_v26, 2  ;;  %v744_v19 = vrot.slane %v743_v60, 4  ;;  %v722_v7 = vsel %vm74_vm0, %v634_v2, 0.0 }
 0x253   :  { %v610_v10 = vpop.permute.xlu1 %609  ;;  %v718_v9 = vrot.slane %v717_v6, 2  ;;  %v723_v47 = vrot.slane %v722_v7, 4  ;;  %v713_v21 = vrot.slane %v712_v22, 1  ;;  %v707_v8 = vadd.f32 %v706_v12, %v705_v5 }
 0x254   :  { %v635_v43 = vmul.f32 %v610_v10, %v1197_v38  ;;  %v691_v3 = vadd.f32 %v690_v63, %v689_v26  ;;  %v745_v13 = vadd.f32 %v744_v19, %v743_v60  ;;  %v686_v30 = vadd.f32 %v685_v41, %v684_v35  ;;  %v903_v41 = vld [vmem:[%s1493_s4] ss:$0 sm:$0xff] }
 0x255   :  { %v724_v36 = vadd.f32 %v723_v47, %v722_v7  ;;  %v719_v17 = vadd.f32 %v718_v9, %v717_v6  ;;  %v774_v38 = vsel %vm400_vm10, %v665_v29, %v773_v32  ;;  %v714_v4 = vadd.f32 %v713_v21, %v712_v22 }
 0x256   :  { %v729_v34 = vsel %vm74_vm0, %v635_v43, 0.0  ;;  %v692_v50 = vrot.slane %v691_v3, 1  ;;  %v775_v54 = vsel %vm402_vm13, %v672_v14, %v774_v38  ;;  %v746_v0 = vrot.slane %v745_v13, 2 }
 0x257   :  { %v730_v16 = vrot.slane %v729_v34, 4  ;;  %v615_v25 = vpop.permute.xlu1 %614  ;;  %v725_v52 = vrot.slane %v724_v36, 2  ;;  %v776_v42 = vsel %vm404_vm14, %v679_v1, %v775_v54  ;;  %v700_v45 = vadd.f32 %v699_v49, %v698_v62 }
 0x258   :  { %v636_v23 = vmul.f32 %v615_v25, %v1205_v44  ;;  %v693_v24 = vadd.f32 %v692_v50, %v691_v3  ;;  %v777_v48 = vsel %vm406_vm1, %v686_v30, %v776_v42  ;;  %v720_v44 = vrot.slane %v719_v17, 1 }
 0x259   :  { %v731_v40 = vadd.f32 %v730_v16, %v729_v34  ;;  %v726_v28 = vadd.f32 %v725_v52, %v724_v36  ;;  %v747_v27 = vadd.f32 %v746_v0, %v745_v13  ;;  %v779_v37 = vsel %vm396_vm4, %v707_v8, %v700_v45 }
 0x25a   :  { %v736_v39 = vsel %vm74_vm0, %v636_v23, 0.0  ;;  %v778_v18 = vsel %vm408_vm6, %v693_v24, %v777_v48  ;;  %v721_v55 = vadd.f32 %v720_v44, %v719_v17  ;;  %v780_v33 = vsel %vm398_vm5, %v714_v4, %v779_v37 }
 0x25b   :  { %v732_v46 = vrot.slane %v731_v40, 2  ;;  %v737_v31 = vrot.slane %v736_v39, 4  ;;  %v727_v20 = vrot.slane %v726_v28, 1  ;;  %920 = vmatprep.mubr.msk.f32.mxu0 %vm74_vm0, %v778_v18  ;;  %v748_v11 = vrot.slane %v747_v27, 1 }
 0x25c   :  { %v781_v26 = vsel %vm400_vm10, %v721_v55, %v780_v33 }
 0x25d   :  { %v733_v51 = vadd.f32 %v732_v46, %v731_v40  ;;  %v738_v61 = vadd.f32 %v737_v31, %v736_v39  ;;  %v728_v15 = vadd.f32 %v727_v20, %v726_v28  ;;  %v749_v59 = vadd.f32 %v748_v11, %v747_v27 }
 0x25f   :  { %v734_v29 = vrot.slane %v733_v51, 1  ;;  %v739_v53 = vrot.slane %v738_v61, 2  ;;  %v782_v58 = vsel %vm402_vm13, %v728_v15, %v781_v26 }
 0x261   :  { %v740_v57 = vadd.f32 %v739_v53, %v738_v61  ;;  %v735_v56 = vadd.f32 %v734_v29, %v733_v51 }
 0x263   :  { %v741_v35 = vrot.slane %v740_v57, 1  ;;  %v783_v6 = vsel %vm404_vm14, %v735_v56, %v782_v58 }
 0x265   :  { %v742_v2 = vadd.f32 %v741_v35, %v740_v57 }
 0x267   :  { %v784_v60 = vsel %vm406_vm1, %v742_v2, %v783_v6 }
 0x268   :  { %v785_v62 = vsel %vm408_vm6, %v749_v59, %v784_v60 }
 0x269   :  { %921 = vmatmul.mubr.msk.f32.vlgmr.msra.gmra.mrb[0].mxu0 %vm74_vm0, %v785_v62 }
 0x33c   :  { %v922_v63 = vpop.f32.mrb[0].mxu0 }
 0x33d   :  { %v862_v19 = vadd.f32 %v922_v63, %v903_v41  ;;  %v856_v10 = vpop.f32.mrb[1].mxu0 }
 0x33e   :  { %v857_v5 = vadd.f32 %v903_v41, %v856_v10 }
 0x33f   :  { %866 = vst [vmem:[#allocation8 + $0x8] sm:$0xff] %v862_v19 }
 0x340   :  { %865 = vst [vmem:[#allocation8] sm:$0xff] %v857_v5 }
 0x341   :  { %1059 = shalt.err (!%p1056_p6)
}
 0x342   :  { %s1060_s4 = scalar_lea.hbm %s1494_s5, 256 }
 0x343   :  { %p1061_p7 = scmp.ne.s32.totalorder %s1494_s5, %s1060_s4  ;;  %p1064_p8 = scmp.lt.u32.totalorder %s1060_s4, %s1494_s5 }
 0x345   :  { %p1066_p9 = pnand %p1064_p8, %p1061_p7 }
 0x347   :  { %1069 = shalt.err (!%p1066_p9)
}
 0x348   :  { %878 = dma.vmem_to_hbm [thread:$0]  %s873_s23, 256, %s1494_s5, [#allocation5], %s1077_s30, %s1077_s30, %s1078_s6  }
 0x349   :  { %1074 = dma.done.wait [#allocation5], 256  }
 0x34a   :  { %1075 = vsyncadd [#allocation5], 4294967040 }
 0x34b   :  { %882 = vsyncpa [#allocation4], 1 }
 0x34c   :  { %883 = vsyncpa [#allocation7], 1 }
 0x34d   :  { %884 = vsyncpa [#allocation5], 1 }

</bundles_post_ra>
